<compile_context>
chip_gen: v7x
topology: tpu7x:2x2x1
jax: 0.10.0
libtpu: 0.0.40
codegen_flags: <defaults>
</compile_context>

<pallas_src>
import math

import numpy as np
import jax
import jax.numpy as jnp
from jax.experimental import pallas as pl
from jax.experimental.pallas import tpu as pltpu

SCALE = 0.05
VMEM_LIMIT = 32 * 1024 * 1024


# ----------------------------------------------------------------------------
# Small helpers
# ----------------------------------------------------------------------------
def _largest_divisor(n, cap):
    for t in range(min(n, cap), 0, -1):
        if n % t == 0:
            return t
    return n


def _pick_conv_tn(N, gsz):
    if N <= 256:
        return N
    for t in range(256, 0, -1):
        if N % t == 0 and t % gsz == 0 and t % 128 == 0:
            return t
    return N


def group_masks(C, groups):
    gsz = C // groups
    gid = np.arange(C) // gsz
    mcg = (gid[:, None] == np.arange(groups)[None, :]).astype(np.float32)  # (C, G)
    return jnp.asarray(mcg), jnp.asarray(np.ascontiguousarray(mcg.T))      # (G, C)


# ----------------------------------------------------------------------------
# Generic tiled matmul (+bias) kernel — variadic (a_i, w_i) pairs, K split.
# Used for 1x1 convs, residual convs on (virtual) concats, time MLP, conv_out.
# ----------------------------------------------------------------------------
def make_matmul_kernel(n_in):
    def kernel(*args):
        a_refs = args[:n_in]
        w_refs = args[n_in:2 * n_in]
        b_ref = args[2 * n_in]
        o_ref = args[2 * n_in + 1]
        acc = jnp.zeros(o_ref.shape, jnp.float32)
        for i in range(n_in):
            acc = acc + jnp.dot(a_refs[i][...].astype(jnp.bfloat16), w_refs[i][...],
                                preferred_element_type=jnp.float32)
        o_ref[...] = acc + b_ref[...]
    return kernel


def pallas_matmul_bias(a_list, w_list, bias):
    """sum_i a_i @ w_i + bias.  a_i: (M, K_i) f32, w_i: (K_i, N) bf16, bias (1, N)."""
    n_in = len(a_list)
    M = a_list[0].shape[0]
    N = w_list[0].shape[1]
    TM = _largest_divisor(M, 256)
    TN = _largest_divisor(N, 256)
    in_specs = []
    for a in a_list:
        in_specs.append(pl.BlockSpec((TM, a.shape[1]), lambda i, j: (i, 0)))
    for w in w_list:
        in_specs.append(pl.BlockSpec((w.shape[0], TN), lambda i, j: (0, j)))
    in_specs.append(pl.BlockSpec((1, TN), lambda i, j: (0, j)))
    return pl.pallas_call(
        make_matmul_kernel(n_in),
        out_shape=jax.ShapeDtypeStruct((M, N), jnp.float32),
        grid=(M // TM, N // TN),
        in_specs=in_specs,
        out_specs=pl.BlockSpec((TM, TN), lambda i, j: (i, j)),
        compiler_params=pltpu.CompilerParams(
            dimension_semantics=("parallel", "parallel"),
            vmem_limit_bytes=VMEM_LIMIT),
    )(*a_list, *w_list, bias)


# ----------------------------------------------------------------------------
# Fused 3x3 conv (+ optional GroupNorm + SiLU + per-row add) kernel.
#
# Input layout ("padded-flat"): NHWC image zero-padded by 1 in H and W,
# flattened over (H+2, W+2), plus 2 extra zero rows: shape (B, PF, Cin) with
# PF = (H+2)*(W+2) + 2.  Each of the 9 taps (a,b) is then simply the slice
# x[off : off+M] with off = a*(W+2)+b and M = H*(W+2) — no im2col in HBM.
# The "wide" output layout is (M, Cout): rows p = i*(W+2)+j, columns j>=W are
# garbage and are either masked (stats / padded output) or sliced off outside.
# With out_padded=True the kernel emits shape (PF, Cout) already padded for
# the next 3x3 conv (used to chain conv1 -> conv2 inside a ResBlock).
# ----------------------------------------------------------------------------
def make_conv3x3_kernel(n_in, H, W, gn, out_padded, gsz, eps):
    Wp = W + 2
    M = H * Wp
    PF = (H + 2) * Wp + 2
    offs = [a * Wp + b for a in range(3) for b in range(3)]
    cnt = float(H * W * gsz)

    def kernel(*args):
        x_refs = args[:n_in]
        w_refs = args[n_in:2 * n_in]
        b_ref = args[2 * n_in]
        if gn:
            gamma_ref, beta_ref, add_ref, mcg_ref, mgc_ref = args[2 * n_in + 1:2 * n_in + 6]
        o_ref = args[-1]
        TN = o_ref.shape[-1]

        acc = jnp.zeros((M, TN), jnp.float32)
        for i in range(n_in):
            for off in offs:
                xs = x_refs[i][0, off:off + M, :].astype(jnp.bfloat16)
                acc = acc + jnp.dot(xs, w_refs[i][offs.index(off) if False else offs.index(off)],
                                    preferred_element_type=jnp.float32) if False else acc
        # (re-done explicitly below for clarity / correct tap indexing)
        acc = jnp.zeros((M, TN), jnp.float32)
        for i in range(n_in):
            for t, off in enumerate(offs):
                xs = x_refs[i][0, off:off + M, :].astype(jnp.bfloat16)
                acc = acc + jnp.dot(xs, w_refs[i][t],
                                    preferred_element_type=jnp.float32)
        acc = acc + b_ref[...]

        if gn or out_padded:
            col = jax.lax.broadcasted_iota(jnp.int32, (M, 1), 0) % Wp
            vmask = (col < W).astype(jnp.float32)

        if gn:
            s1 = jnp.sum(acc * vmask, axis=0, keepdims=True)           # (1, TN)
            s2 = jnp.sum(acc * acc * vmask, axis=0, keepdims=True)
            g1 = jnp.dot(s1, mcg_ref[...], preferred_element_type=jnp.float32) / cnt
            g2 = jnp.dot(s2, mcg_ref[...], preferred_element_type=jnp.float32) / cnt
            var_g = jnp.maximum(g2 - g1 * g1, 0.0)
            inv_g = jax.lax.rsqrt(var_g + eps)
            mean_c = jnp.dot(g1, mgc_ref[...], preferred_element_type=jnp.float32)
            inv_c = jnp.dot(inv_g, mgc_ref[...], preferred_element_type=jnp.float32)
            y = (acc - mean_c) * inv_c * gamma_ref[...] + beta_ref[...]
            y = y * jax.nn.sigmoid(y)                                  # SiLU
            y = y + add_ref[0]                                         # time-emb add
        else:
            y = acc

        if out_padded:
            y = y * vmask
            zpad = jnp.zeros((Wp + 1, TN), jnp.float32)
            o_ref[0] = jnp.concatenate([zpad, y, zpad], axis=0)        # (PF, TN)
        else:
            o_ref[0] = y
    return kernel


def conv3x3_fused(xs_padded, ws, bias, H, W, *, gn=None, add=None,
                  out_padded=False, groups=8, eps=1e-5):
    """xs_padded: list of (B, PF, Cin_i) padded-flat inputs; ws: list of
    (9, Cin_i, Cout) bf16 weights (K split over the virtual concat)."""
    n_in = len(xs_padded)
    B = xs_padded[0].shape[0]
    N = ws[0].shape[2]
    Wp = W + 2
    M = H * Wp
    PF = (H + 2) * Wp + 2
    assert xs_padded[0].shape[1] == PF
    gsz = max(N // groups, 1)
    TN = _pick_conv_tn(N, gsz)
    grid = (B, N // TN)

    in_specs = []
    args = []
    for x in xs_padded:
        in_specs.append(pl.BlockSpec((1, PF, x.shape[2]), lambda b, n: (b, 0, 0)))
        args.append(x)
    for w in ws:
        in_specs.append(pl.BlockSpec((9, w.shape[1], TN), lambda b, n: (0, 0, n)))
        args.append(w)
    in_specs.append(pl.BlockSpec((1, TN), lambda b, n: (0, n)))
    args.append(bias)
    if gn is not None:
        if add is None:
            add = jnp.zeros((B, N), jnp.float32)
        in_specs += [
            pl.BlockSpec((1, TN), lambda b, n: (0, n)),        # gamma
            pl.BlockSpec((1, TN), lambda b, n: (0, n)),        # beta
            pl.BlockSpec((1, 1, TN), lambda b, n: (b, 0, n)),  # per-row add
            pl.BlockSpec((TN, groups), lambda b, n: (n, 0)),   # channel->group
            pl.BlockSpec((groups, TN), lambda b, n: (0, n)),   # group->channel
        ]
        args += [gn['gamma'], gn['beta'], add.reshape(B, 1, N), gn['mcg'], gn['mgc']]

    out_rows = PF if out_padded else M
    kernel = make_conv3x3_kernel(n_in, H, W, gn is not None, out_padded, gsz, eps)
    return pl.pallas_call(
        kernel,
        out_shape=jax.ShapeDtypeStruct((B, out_rows, N), jnp.float32),
        grid=grid,
        in_specs=in_specs,
        out_specs=pl.BlockSpec((1, out_rows, TN), lambda b, n: (b, 0, n)),
        compiler_params=pltpu.CompilerParams(
            dimension_semantics=("parallel", "parallel"),
            vmem_limit_bytes=VMEM_LIMIT),
    )(*args)


def pad_flat(x):
    """NHWC (B,H,W,C) -> padded-flat (B, (H+2)*(W+2)+2, C)."""
    B, H, W, C = x.shape
    xp = jnp.pad(x, ((0, 0), (1, 1), (1, 1), (0, 0)))
    xp = xp.reshape(B, (H + 2) * (W + 2), C)
    return jnp.pad(xp, ((0, 0), (0, 2), (0, 0)))


def wide_to_nhwc(y, H, W):
    """wide-flat (B, H*(W+2), C) -> NHWC (B, H, W, C)."""
    B = y.shape[0]
    C = y.shape[-1]
    return y.reshape(B, H, W + 2, C)[:, :, :W, :]


def conv3x3_plain(x_nhwc, p):
    B, H, W, _ = x_nhwc.shape
    y = conv3x3_fused([pad_flat(x_nhwc)], [p['w']], p['b'], H, W)
    return wide_to_nhwc(y, H, W)


# ----------------------------------------------------------------------------
# Attention (RMSNorm -> qkv -> softmax attention -> out proj -> +residual)
# ----------------------------------------------------------------------------
def make_attention_kernel(heads, dim_head):
    def kernel(x_ref, g_ref, wqkv_ref, wout_ref, bout_ref, o_ref):
        x = x_ref[0]                                     # (HW, C) fp32
        C = x.shape[-1]
        HD = heads * dim_head
        scale = float(dim_head) ** -0.5
        ss = jnp.sum(x * x, axis=-1, keepdims=True)
        inv = jax.lax.rsqrt(jnp.maximum(ss, 1e-24))      # F.normalize (eps=1e-12)
        xn = x * inv * g_ref[...] * (float(C) ** 0.5)
        qkv = jnp.dot(xn.astype(jnp.bfloat16), wqkv_ref[...],
                      preferred_element_type=jnp.float32)          # (HW, 3*HD)
        o_acc = jnp.zeros_like(x)
        for h in range(heads):
            lo = h * dim_head
            qh = (qkv[:, lo:lo + dim_head] * scale).astype(jnp.bfloat16)
            kh = qkv[:, HD + lo:HD + lo + dim_head].astype(jnp.bfloat16)
            vh = qkv[:, 2 * HD + lo:2 * HD + lo + dim_head].astype(jnp.bfloat16)
            sim = jax.lax.dot_general(qh, kh, (((1,), (1,)), ((), ())),
                                      preferred_element_type=jnp.float32)  # (HW,HW)
            sim = sim - jnp.max(sim, axis=-1, keepdims=True)
            pmat = jnp.exp(sim)
            pmat = pmat * pl.reciprocal(jnp.sum(pmat, axis=-1, keepdims=True),
                                        approx=True)
            oh = jnp.dot(pmat.astype(jnp.bfloat16), vh,
                         preferred_element_type=jnp.float32)               # (HW, dh)
            # accumulate the output projection per head -> no concatenate
            o_acc = o_acc + jnp.dot(oh.astype(jnp.bfloat16), wout_ref[h],
                                    preferred_element_type=jnp.float32)
        o_ref[0] = o_acc + bout_ref[...] + x
    return kernel


def pallas_attention(x, p):
    B, H, W, C = x.shape
    HW = H * W
    heads, dh = p['heads'], p['dim_head']
    HD = heads * dh
    xr = x.reshape(B, HW, C)
    out = pl.pallas_call(
        make_attention_kernel(heads, dh),
        out_shape=jax.ShapeDtypeStruct((B, HW, C), jnp.float32),
        grid=(B,),
        in_specs=[
            pl.BlockSpec((1, HW, C), lambda b: (b, 0, 0)),
            pl.BlockSpec((1, C), lambda b: (0, 0)),
            pl.BlockSpec((C, 3 * HD), lambda b: (0, 0)),
            pl.BlockSpec((heads, dh, C), lambda b: (0, 0, 0)),
            pl.BlockSpec((1, C), lambda b: (0, 0)),
        ],
        out_specs=pl.BlockSpec((1, HW, C), lambda b: (b, 0, 0)),
        compiler_params=pltpu.CompilerParams(
            dimension_semantics=("parallel",), vmem_limit_bytes=VMEM_LIMIT),
    )(xr, p['g'], p['wqkv'], p['wout'], p['bout'])
    return out.reshape(B, H, W, C)


# ----------------------------------------------------------------------------
# Layout glue (XLA)
# ----------------------------------------------------------------------------
def pixel_unshuffle(x):
    """'b c (h p1) (w p2) -> b (c p1 p2) h w' expressed in NHWC."""
    B, H, W, C = x.shape
    x = x.reshape(B, H // 2, 2, W // 2, 2, C)
    x = jnp.transpose(x, (0, 1, 3, 5, 2, 4))
    return x.reshape(B, H // 2, W // 2, C * 4)


def upsample_nearest(x):
    # TODO(synk): fold nearest-neighbor upsample into the consuming conv's DMA
    # (index_map i//2) instead of a standalone jnp.repeat round trip.
    x = jnp.repeat(x, 2, axis=1)
    return jnp.repeat(x, 2, axis=2)


def sinusoidal_embedding(t, dim):
    half = dim // 2
    exponent = -math.log(10000.0) * jnp.arange(half, dtype=jnp.float32) / (half - 1.0)
    emb = jnp.exp(exponent)
    emb = t.astype(jnp.float32)[:, None] * emb[None, :]
    return jnp.concatenate([jnp.sin(emb), jnp.cos(emb)], axis=-1)


# ----------------------------------------------------------------------------
# Parameters (deterministic synthetic weights, matmul-ready, bf16 MXU operands)
# ----------------------------------------------------------------------------
class KeyGen:
    def __init__(self, key):
        self.key = key

    def __call__(self):
        self.key, sub = jax.random.split(self.key)
        return sub


def _bf16(x):
    return x.astype(jnp.bfloat16)


def init_conv3(kg, cin, cout):
    return {'w': _bf16(jax.random.normal(kg(), (9, cin, cout), jnp.float32) * SCALE),
            'b': jax.random.normal(kg(), (1, cout), jnp.float32) * SCALE}


def init_conv1(kg, cin, cout):
    return {'w': _bf16(jax.random.normal(kg(), (cin, cout), jnp.float32) * SCALE),
            'b': jax.random.normal(kg(), (1, cout), jnp.float32) * SCALE}


def init_linear(kg, cin, cout):
    return {'w': _bf16(jax.random.normal(kg(), (cin, cout), jnp.float32) * SCALE),
            'b': jax.random.normal(kg(), (1, cout), jnp.float32) * SCALE}


def init_res(kg, cin, cout, tdim, groups=8):
    mcg, mgc = group_masks(cout, groups)

    def gn():
        return {'gamma': jnp.ones((1, cout), jnp.float32),
                'beta': jnp.zeros((1, cout), jnp.float32),
                'mcg': mcg, 'mgc': mgc}

    p = {
        'cout': cout,
        'w1': _bf16(jax.random.normal(kg(), (9, cin, cout), jnp.float32) * SCALE),
        'b1': jax.random.normal(kg(), (1, cout), jnp.float32) * SCALE,
        'w2': _bf16(jax.random.normal(kg(), (9, cout, cout), jnp.float32) * SCALE),
        'b2': jax.random.normal(kg(), (1, cout), jnp.float32) * SCALE,
        'temb_w': _bf16(jax.random.normal(kg(), (tdim, cout), jnp.float32) * SCALE),
        'temb_b': jax.random.normal(kg(), (1, cout), jnp.float32) * SCALE,
        'gn1': gn(), 'gn2': gn(),
    }
    if cin != cout:
        p['res_w'] = _bf16(jax.random.normal(kg(), (cin, cout), jnp.float32) * SCALE)
        p['res_b'] = jax.random.normal(kg(), (1, cout), jnp.float32) * SCALE
    else:
        p['res_w'] = None
        p['res_b'] = None
    return p


def init_attn(kg, dim, heads=4, dim_head=32):
    hd = heads * dim_head
    return {'g': jnp.ones((1, dim), jnp.float32),
            'wqkv': _bf16(jax.random.normal(kg(), (dim, 3 * hd), jnp.float32) * SCALE),
            'wout': _bf16(jax.random.normal(kg(), (heads, dim_head, dim), jnp.float32) * SCALE),
            'bout': jax.random.normal(kg(), (1, dim), jnp.float32) * SCALE,
            'heads': heads, 'dim_head': dim_head}


def init_conv_out(kg, cin, cout, npad=128):
    w = jax.random.normal(kg(), (cin, cout), jnp.float32) * SCALE
    b = jax.random.normal(kg(), (1, cout), jnp.float32) * SCALE
    wpad = jnp.zeros((cin, npad), jnp.float32).at[:, :cout].set(w)
    bpad = jnp.zeros((1, npad), jnp.float32).at[:, :cout].set(b)
    return {'w': _bf16(wpad), 'b': bpad, 'cout': cout}


def build_params(key, in_channels, hidden_dims, heads=4, dim_head=32):
    kg = KeyGen(key)
    n = len(hidden_dims)
    tdim = hidden_dims[0] * 4
    params = {
        'time1': init_linear(kg, hidden_dims[0], tdim),
        'time2': init_linear(kg, tdim, tdim),
        'init_conv': init_conv3(kg, in_channels, hidden_dims[0]),
    }
    down = []
    in_dim = hidden_dims[0]
    for idx, hd in enumerate(hidden_dims[1:]):
        is_last = idx >= n - 2
        is_first = idx == 0
        blk = {
            'res1': init_res(kg, in_dim, in_dim, tdim),
            'res2': init_res(kg, in_dim, in_dim, tdim),
            'attn': None if is_first else init_attn(kg, in_dim, heads, dim_head),
        }
        if not is_last:
            blk['down'] = dict(type='shuffle', **init_conv1(kg, in_dim * 4, hd))
        else:
            blk['down'] = dict(type='conv', **init_conv3(kg, in_dim, hd))
        down.append(blk)
        in_dim = hd
    params['down'] = down

    mid = hidden_dims[-1]
    params['mid1'] = init_res(kg, mid, mid, tdim)
    params['mid_attn'] = init_attn(kg, mid, heads, dim_head)
    params['mid2'] = init_res(kg, mid, mid, tdim)

    up = []
    in_dim = mid
    for idx, hd in enumerate(list(reversed(hidden_dims[:-1]))):
        is_last = idx >= n - 2
        blk = {
            'res1': init_res(kg, in_dim + hd, in_dim, tdim),
            'res2': init_res(kg, in_dim + hd, in_dim, tdim),
            'attn': None if is_last else init_attn(kg, in_dim, heads, dim_head),
            'up': dict(type='conv' if is_last else 'up', **init_conv3(kg, in_dim, hd)),
        }
        up.append(blk)
        in_dim = hd
    params['up'] = up

    params['out_block'] = init_res(kg, hidden_dims[0] * 2, hidden_dims[0], tdim)
    params['conv_out'] = init_conv_out(kg, hidden_dims[0], 3)
    return params


# ----------------------------------------------------------------------------
# Forward pass
# ----------------------------------------------------------------------------
def resblock_forward(xs, st, p):
    """xs: list of NHWC tensors forming the (virtual, never materialized)
    channel concat.  st = SiLU(time embedding), shape (B, tdim)."""
    B, H, W, _ = xs[0].shape
    cins = [x.shape[-1] for x in xs]
    offs = np.cumsum([0] + cins)
    cout = p['cout']

    # Residual path (1x1 conv on virtual concat, K split across inputs).
    if p['res_w'] is not None:
        flats = [x.reshape(-1, x.shape[-1]) for x in xs]
        rws = [p['res_w'][offs[i]:offs[i + 1]] for i in range(len(xs))]
        res = pallas_matmul_bias(flats, rws, p['res_b']).reshape(B, H, W, cout)
    else:
        res = xs[0]

    # Time-embedding projection (Linear(SiLU(temb))).
    tproj = pallas_matmul_bias([st], [p['temb_w']], p['temb_b'])           # (B, cout)

    # conv1 + GN1 + SiLU + temb-add, output already padded for conv2.
    w1s = [p['w1'][:, offs[i]:offs[i + 1], :] for i in range(len(xs))]
    h_pad = conv3x3_fused([pad_flat(x) for x in xs], w1s, p['b1'], H, W,
                          gn=p['gn1'], add=tproj, out_padded=True)

    # conv2 + GN2 + SiLU, then residual add.
    h = conv3x3_fused([h_pad], [p['w2']], p['b2'], H, W,
                      gn=p['gn2'], add=None, out_padded=False)
    return wide_to_nhwc(h, H, W) + res


def downsample_forward(x, p):
    if p['type'] == 'shuffle':
        x = pixel_unshuffle(x)
        B, H, W, C = x.shape
        y = pallas_matmul_bias([x.reshape(-1, C)], [p['w']], p['b'])
        return y.reshape(B, H, W, -1)
    return conv3x3_plain(x, p)


def upsample_forward(x, p):
    if p['type'] == 'up':
        x = upsample_nearest(x)
    return conv3x3_plain(x, p)


def unet_forward(params, sample_nchw, timesteps, hidden_dims):
    x = jnp.transpose(sample_nchw, (0, 2, 3, 1)).astype(jnp.float32)  # NCHW -> NHWC
    B = x.shape[0]
    t = jnp.broadcast_to(jnp.ravel(jnp.asarray(timesteps)), (B,))
    temb = sinusoidal_embedding(t, hidden_dims[0])
    temb = pallas_matmul_bias([temb], [params['time1']['w']], params['time1']['b'])
    temb = jax.nn.silu(temb)
    temb = pallas_matmul_bias([temb], [params['time2']['w']], params['time2']['b'])
    st = jax.nn.silu(temb)  # shared SiLU(temb) feeding every ResBlock's projection

    x = conv3x3_plain(x, params['init_conv'])
    r = x
    skips = []
    for blk in params['down']:
        x = resblock_forward([x], st, blk['res1'])
        skips.append(x)
        x = resblock_forward([x], st, blk['res2'])
        if blk['attn'] is not None:
            x = pallas_attention(x, blk['attn'])
        skips.append(x)
        x = downsample_forward(x, blk['down'])

    x = resblock_forward([x], st, params['mid1'])
    x = pallas_attention(x, params['mid_attn'])
    x = resblock_forward([x], st, params['mid2'])

    for blk in params['up']:
        x = resblock_forward([x, skips.pop()], st, blk['res1'])
        x = resblock_forward([x, skips.pop()], st, blk['res2'])
        if blk['attn'] is not None:
            x = pallas_attention(x, blk['attn'])
        x = upsample_forward(x, blk['up'])

    x = resblock_forward([x, r], st, params['out_block'])

    B2, H, W, C = x.shape
    y = pallas_matmul_bias([x.reshape(-1, C)], [params['conv_out']['w']],
                           params['conv_out']['b'])
    y = y.reshape(B2, H, W, -1)[..., :params['conv_out']['cout']]
    return {'sample': jnp.transpose(y, (0, 3, 1, 2))}  # back to NCHW


# ----------------------------------------------------------------------------
if __name__ == "__main__":
    B, C_IN, IMG = 2, 3, 16
    hidden_dims = [32, 64, 128]   # scaled-down version of [64, 128, 256, 512]

    root = jax.random.PRNGKey(0)
    k_sample, k_params = jax.random.split(root)
    sample = jax.random.normal(k_sample, (B, C_IN, IMG, IMG), jnp.float32)
    timesteps = jnp.array([3, 7], dtype=jnp.int32)

    params = build_params(k_params, C_IN, hidden_dims)
    out = unet_forward(params, sample, timesteps, hidden_dims)
    y = jax.block_until_ready(out['sample'])
    assert y.shape == (B, 3, IMG, IMG), y.shape
    assert bool(jnp.all(jnp.isfinite(y)))
    print("KERNEL_OK")
</pallas_src>

<mosaic_0001>
module attributes {stable_mosaic.version = 11 : i64} {
  func.func @kernel(%arg0: i32, %arg1: i32, %arg2: memref<2x32xf32, #tpu.memory_space<vmem>>, %arg3: memref<32x128xbf16, #tpu.memory_space<vmem>>, %arg4: memref<1x128xf32, #tpu.memory_space<vmem>>, %arg5: memref<2x128xf32, #tpu.memory_space<vmem>>) attributes {dimension_semantics = [#tpu.dimension_semantics<parallel>, #tpu.dimension_semantics<parallel>], iteration_bounds = array<i64: 1, 1>, scalar_prefetch = 0 : i64, scratch_operands = 0 : i64, tpu.core_type = #tpu.core_type<tc>, window_params = [{transform_indices = @transform_0, window_bounds = array<i64: 2, 32>}, {transform_indices = @transform_1, window_bounds = array<i64: 32, 128>}, {transform_indices = @transform_2, window_bounds = array<i64: 1, 128>}, {transform_indices = @transform_3, window_bounds = array<i64: 2, 128>}]} {
    %cst = arith.constant 0.000000e+00 : f32
    %0 = vector.broadcast %cst : f32 to vector<2x128xf32>
    %c0 = arith.constant 0 : index
    %c0_0 = arith.constant 0 : index
    %1 = vector.load %arg2[%c0, %c0_0] : memref<2x32xf32, #tpu.memory_space<vmem>>, vector<2x32xf32>
    %2 = arith.truncf %1 : vector<2x32xf32> to vector<2x32xbf16>
    %c0_1 = arith.constant 0 : index
    %c0_2 = arith.constant 0 : index
    %3 = vector.load %arg3[%c0_1, %c0_2] : memref<32x128xbf16, #tpu.memory_space<vmem>>, vector<32x128xbf16>
    %cst_3 = arith.constant dense<0.000000e+00> : vector<2x128xf32>
    %4 = tpu.matmul %2, %3, %cst_3 {dimension_numbers = #tpu.dot_dimension_numbers<[1], [0], [0], [1], [0, 0, 1, 1], [], []>} : vector<2x32xbf16>, vector<32x128xbf16>, vector<2x128xf32> -> vector<2x128xf32>
    %5 = arith.addf %0, %4 : vector<2x128xf32>
    %c0_4 = arith.constant 0 : index
    %c0_5 = arith.constant 0 : index
    %6 = vector.load %arg4[%c0_4, %c0_5] : memref<1x128xf32, #tpu.memory_space<vmem>>, vector<1x128xf32>
    %7 = vector.broadcast %6 : vector<1x128xf32> to vector<2x128xf32>
    %8 = arith.addf %5, %7 : vector<2x128xf32>
    %c0_6 = arith.constant 0 : index
    %c0_7 = arith.constant 0 : index
    %9 = vector.load %arg5[%c0_6, %c0_7] : memref<2x128xf32, #tpu.memory_space<vmem>>, vector<2x128xf32>
    tpu.vector_store %arg5[%c0_6, %c0_7], %8 {strides = array<i32>} : memref<2x128xf32, #tpu.memory_space<vmem>>, vector<2x128xf32>,
    return
  }
  func.func @transform_0(%arg0: i32, %arg1: i32) -> (i32, i32) {
    %c0_i32 = arith.constant 0 : i32
    %c0_i32_0 = arith.constant 0 : i32
    return %arg0, %c0_i32 : i32, i32
  }
  func.func @transform_1(%arg0: i32, %arg1: i32) -> (i32, i32) {
    %c0_i32 = arith.constant 0 : i32
    %c0_i32_0 = arith.constant 0 : i32
    return %c0_i32, %arg1 : i32, i32
  }
  func.func @transform_2(%arg0: i32, %arg1: i32) -> (i32, i32) {
    %c0_i32 = arith.constant 0 : i32
    %c0_i32_0 = arith.constant 0 : i32
    return %c0_i32, %arg1 : i32, i32
  }
  func.func @transform_3(%arg0: i32, %arg1: i32) -> (i32, i32) {
    %c0_i32 = arith.constant 0 : i32
    return %arg0, %arg1 : i32, i32
  }
}

</mosaic_0001>

<bundles_post_ra>
// kernel: tpu_custom_call.1
= control target key start
LH: loop header
LB: loop body
LE: loop exit
PB: predicated region body
PF: predicated region fallthrough
CT: control target
= control target key end

     0   :  { %8 = vsyncpa [#allocation3], 0  ;;  %s297_s0 = inlined_call_operand.hbm [shape: f32[2,32], index: 0, kind: input, shape index: {}]   ;;  %s298_s1 = inlined_call_operand.hbm [shape: bf16[32,128], index: 1, kind: input, shape index: {}]   ;;  %s299_s2 = inlined_call_operand.vmem [shape: f32[1,128], index: 2, kind: input, shape index: {}]   ;;  %s300_s3 = inlined_call_operand.hbm [shape: f32[2,128], index: 3, kind: output, shape index: {}]  }
   0x1   :  { %9 = vsyncpa [#allocation6], 0 }
   0x2   :  { %10 = vsyncpa [#allocation4], 0  ;;  %s224_s12 = smov [#allocation2]   ;;  %s225_s14 = smov [#allocation5]  }
   0x3   :  { %s17_s13 = sshll.u32 %s224_s12, 4  ;;  %s26_s15 = sshll.u32 %s225_s14, 4  ;;  %s18_s13 = int_to_ptr.vmem [resolvable:$true] %s17_s13  ;;  %s251_s15 = int_to_ptr.vmem [resolvable:$true] %s26_s15 }
   0x4   :  { %s152_s18 = scalar_lea.hbm %s297_s0, 32 }
   0x5   :  { %p153_p0 = scmp.ne.s32.totalorder %s297_s0, %s152_s18  ;;  %p156_p1 = scmp.lt.u32.totalorder %s152_s18, %s297_s0 }
   0x7   :  { %p158_p2 = pnand %p156_p1, %p153_p0 }
   0x9   :  { %161 = shalt.err (!%p158_p2)
}
   0xa   :  { %s162_s23 = scalar_lea.vmem %s18_s13, 32  ;;  %p167_p4 = scmp.lt.s32.totalorder %s18_s13, %s18_s13 }
   0xb   :  { %p163_p3 = scmp.ne.s32.totalorder %s18_s13, %s162_s23  ;;  %p168_p5 = scmp.lt.s32.totalorder %s162_s23, %s162_s23 }
   0xd   :  { %p169_p6 = por %p168_p5, %p167_p4 }
   0xf   :  { %p170_p7 = pnand %p169_p6, %p163_p3 }
  0x11   :  { %173 = shalt.err (!%p170_p7)
}
  0x12   :  { %20 = dma.hbm_to_vmem [thread:$0]  %s297_s0, 32, %s18_s13, [#allocation3]  }
  0x13   :  { %s174_s28 = scalar_lea.hbm %s298_s1, 256 }
  0x14   :  { %p175_p8 = scmp.ne.s32.totalorder %s298_s1, %s174_s28  ;;  %p178_p9 = scmp.lt.u32.totalorder %s174_s28, %s298_s1 }
  0x16   :  { %p180_p10 = pnand %p178_p9, %p175_p8 }
  0x18   :  { %183 = shalt.err (!%p180_p10)
}
  0x19   :  { %s184_s6 = scalar_lea.vmem %s251_s15, 256  ;;  %p189_p12 = scmp.lt.s32.totalorder %s251_s15, %s251_s15 }
  0x1a   :  { %p185_p11 = scmp.ne.s32.totalorder %s251_s15, %s184_s6  ;;  %p190_p13 = scmp.lt.s32.totalorder %s184_s6, %s184_s6 }
  0x1c   :  { %p191_p0 = por %p190_p13, %p189_p12 }
  0x1e   :  { %p192_p1 = pnand %p191_p0, %p185_p11 }
  0x20   :  { %195 = shalt.err (!%p192_p1)
}
  0x21   :  { %s226_s0 = smov 64   ;;  %s227_s7 = smov 4  }
  0x22   :  { %32 = dma.hbm_to_vmem [thread:$0]  %s298_s1, 256, %s251_s15, [#allocation6], %s226_s0, %s226_s0, %s227_s7  }
  0x23   :  { %218 = dma.done.wait [#allocation3], 32  }
  0x24   :  { %219 = vsyncadd [#allocation3], 4294967264 }
  0x25   :  { %220 = dma.done.wait [#allocation6], 256  }
  0x26   :  { %221 = vsyncadd [#allocation6], 4294967040  ;;  %v228_v0 = vmov 0.0   ;;  %vm229_vm0 = vmmov 0   ;;  %v150_v1 = vld [vmem:[#allocation5] sm:$0xff]   ;;  %v151_v2 = vld [vmem:[#allocation5 + $0x8] sm:$0xff]  }
  0x27   :  { %135 = vmatprep.subr.bf16.mxu0 %v228_v0  ;;  %139 = vmatprep.mubr.msk.bf16.mxu0 %vm229_vm0, %v228_v0  ;;  %v42_v3 = vld [vmem:[#allocation2] sm:$0x3]  ;;  %vm67_vm1 = vcmask 261120   ;;  %s230_s1 = smov [#allocation7]  }
  0x28   :  { %136 = vmatpush3.bf16.msra.mxu0 %v150_v1  ;;  %v43_v4 = vpack.c.bf16 %v42_v3, %v42_v3  ;;  %v128_v5 = vld [vmem:[%s299_s2] ss:$0 sm:$0xff]  ;;  %s118_s12 = sshll.u32 %s230_s1, 4  ;;  %s119_s12 = int_to_ptr.vmem [resolvable:$true] %s118_s12 }
  0x29   :  { %137 = vmatprep.subr.bf16.mxu0 %v228_v0  ;;  %s196_s13 = scalar_lea.vmem %s119_s12, 32  ;;  %p201_p3 = scmp.lt.s32.totalorder %s119_s12, %s119_s12 }
  0x2a   :  { %p197_p2 = scmp.ne.s32.totalorder %s119_s12, %s196_s13  ;;  %p202_p4 = scmp.lt.s32.totalorder %s196_s13, %s196_s13 }
  0x2c   :  { %138 = vmatpush3.bf16.msra.mxu0 %v151_v2  ;;  %p203_p5 = por %p202_p4, %p201_p3 }
  0x2e   :  { %p204_p6 = pnand %p203_p5, %p197_p2 }
  0x2f   :  { %140 = vmatmul.mubr.msk.bf16.vlgmr.msra.gmra.mrb[0].mxu0 %vm67_vm1, %v43_v4 }
 0x102   :  { %v105_v6 = vpop.f32.mrb[0].mxu0 }
 0x103   :  { %v106_v7 = vadd.f32 %v128_v5, %v105_v6  ;;  %v141_v8 = vpop.f32.mrb[1].mxu0 }
 0x104   :  { %v108_v9 = vpop.f32.mrb[2].mxu0 }
 0x105   :  { %111 = vst [vmem:[#allocation7] sm:$0x3] %v106_v7  ;;  %v142_v10 = vpop.f32.mrb[3].mxu0 }
 0x106   :  { %207 = shalt.err (!%p204_p6)
}
 0x107   :  { %s208_s2 = scalar_lea.hbm %s300_s3, 32 }
 0x108   :  { %p209_p7 = scmp.ne.s32.totalorder %s300_s3, %s208_s2  ;;  %p212_p8 = scmp.lt.u32.totalorder %s208_s2, %s300_s3 }
 0x10a   :  { %p214_p9 = pnand %p212_p8, %p209_p7 }
 0x10c   :  { %217 = shalt.err (!%p214_p9)
}
 0x10d   :  { %121 = dma.vmem_to_hbm [thread:$0]  %s119_s12, 32, %s300_s3, [#allocation4]  }
 0x10e   :  { %222 = dma.done.wait [#allocation4], 32  }
 0x10f   :  { %223 = vsyncadd [#allocation4], 4294967264 }
 0x110   :  { %125 = vsyncpa [#allocation3], 1 }
 0x111   :  { %126 = vsyncpa [#allocation6], 1 }
 0x112   :  { %127 = vsyncpa [#allocation4], 1 }

</bundles_post_ra>
